<compile_context>
chip_gen: v7x
topology: tpu7x:2x2x1
jax: 0.10.0
libtpu: 0.0.40
codegen_flags: <defaults>
</compile_context>

<pallas_src>
import jax
import jax.numpy as jnp
from jax.experimental import pallas as pl
from jax.experimental.pallas import tpu as pltpu

BN_EPS = 1e-5

# dot_general dimension numbers contracting dim 0 of both operands (transposed-LHS matmul).
_CONTRACT0 = (((0,), (0,)), ((), ()))


def encoder_kernel(xT_ref, w1_ref, b1_ref, gamma_ref, beta_ref, w2_ref, b2_ref, oT_ref):
    xT = xT_ref[...]                                            # [12, B]  batch on lanes
    B = xT.shape[1]

    # fc1 + ReLU : h = relu(W1 @ x^T + b1)                      # [8, B]
    h = jnp.dot(w1_ref[...], xT, preferred_element_type=jnp.float32) + b1_ref[...]
    h = jnp.maximum(h, 0.0)

    # BatchNorm1d stats over the batch (lane) axis via ones-vector matmuls (MXU).
    ones_b = jnp.ones((B, 1), jnp.float32)
    inv_b = jnp.float32(1.0 / B)
    mean = jnp.dot(h, ones_b, preferred_element_type=jnp.float32) * inv_b        # [8, 1]
    centered = h - mean                                                          # [8, B]
    var = jnp.dot(centered * centered, ones_b,
                  preferred_element_type=jnp.float32) * inv_b                    # [8, 1] biased

    # Fold BN scale/affine into the fc2 operands.
    scale = gamma_ref[...] * jax.lax.rsqrt(var + BN_EPS)                         # [8, 1]
    w2_eff = w2_ref[...] * scale                                                 # [8, latent]
    b2_eff = jax.lax.dot_general(w2_ref[...], beta_ref[...], _CONTRACT0,
                                 preferred_element_type=jnp.float32) + b2_ref[...]  # [latent, 1]

    # fc2 + ReLU : y = relu(w2_eff^T @ centered + b2_eff)                        # [latent, B]
    y = jax.lax.dot_general(w2_eff, centered, _CONTRACT0,
                            preferred_element_type=jnp.float32) + b2_eff
    oT_ref[...] = jnp.maximum(y, 0.0)


def encoder_forward(x, params):
    """x: [B, 12] float32 -> [B, latent] float32."""
    w1, b1, gamma, beta, w2, b2 = params
    B = x.shape[0]
    latent = w2.shape[1]
    xT = x.T                                                    # [12, B] lane-dense layout
    yT = pl.pallas_call(
        encoder_kernel,
        out_shape=jax.ShapeDtypeStruct((latent, B), jnp.float32),
        in_specs=[pl.BlockSpec(memory_space=pltpu.MemorySpace.VMEM)] * 7,
        out_specs=pl.BlockSpec(memory_space=pltpu.MemorySpace.VMEM),
    )(xT, w1, b1, gamma, beta, w2, b2)
    return yT.T                                                 # back to [B, latent]


def init_params(key, latent_size):
    """Deterministic parameter init matching the PyTorch module's shapes.

    fc1: weight [8, 12] (out, in), bias stored as [8, 1]
    batch_norm1: gamma/beta stored as [8, 1]
    fc2: weight stored as [8, latent] (in, out), bias stored as [latent, 1]
    """
    k1, k2, k3, k4 = jax.random.split(key, 4)
    # PyTorch Linear default init: U(-1/sqrt(fan_in), 1/sqrt(fan_in))
    lim1 = 1.0 / jnp.sqrt(12.0)
    lim2 = 1.0 / jnp.sqrt(8.0)
    w1 = jax.random.uniform(k1, (8, 12), jnp.float32, -lim1, lim1)
    b1 = jax.random.uniform(k2, (8, 1), jnp.float32, -lim1, lim1)
    gamma = jnp.ones((8, 1), jnp.float32)     # BatchNorm1d default affine init
    beta = jnp.zeros((8, 1), jnp.float32)
    w2 = jax.random.uniform(k3, (8, latent_size), jnp.float32, -lim2, lim2)
    b2 = jax.random.uniform(k4, (latent_size, 1), jnp.float32, -lim2, lim2)
    return (w1, b1, gamma, beta, w2, b2)


def encoder_ref(x, params):
    """Pure-JAX reference (PyTorch semantics) for correctness checking."""
    w1, b1, gamma, beta, w2, b2 = params
    h = jnp.maximum(x @ w1.T + b1.T, 0.0)
    mean = jnp.mean(h, axis=0, keepdims=True)
    var = jnp.mean((h - mean) ** 2, axis=0, keepdims=True)
    h = (h - mean) / jnp.sqrt(var + BN_EPS) * gamma.T + beta.T
    return jnp.maximum(h @ w2 + b2.T, 0.0)


if __name__ == "__main__":
    latent_size = 4
    B = 8
    key = jax.random.PRNGKey(0)
    kx, kp = jax.random.split(key)
    x = jax.random.normal(kx, (B, 12), jnp.float32)
    params = init_params(kp, latent_size)

    out = encoder_forward(x, params)
    jax.block_until_ready(out)

    ref = encoder_ref(x, params)
    assert out.shape == (B, latent_size)
    assert jnp.allclose(out, ref, atol=1e-4, rtol=1e-4), "mismatch vs pure-JAX reference"
    print("KERNEL_OK")
</pallas_src>

<mosaic_0001>
module attributes {stable_mosaic.version = 11 : i64} {
  func.func @encoder_kernel(%arg0: memref<12x8xf32, #tpu.memory_space<vmem>>, %arg1: memref<8x12xf32, #tpu.memory_space<vmem>>, %arg2: memref<8x1xf32, #tpu.memory_space<vmem>>, %arg3: memref<8x1xf32, #tpu.memory_space<vmem>>, %arg4: memref<8x1xf32, #tpu.memory_space<vmem>>, %arg5: memref<8x4xf32, #tpu.memory_space<vmem>>, %arg6: memref<4x1xf32, #tpu.memory_space<vmem>>, %arg7: memref<4x8xf32, #tpu.memory_space<vmem>>) attributes {dimension_semantics = [], scalar_prefetch = 0 : i64, scratch_operands = 0 : i64, tpu.core_type = #tpu.core_type<tc>} {
    %c0 = arith.constant 0 : index
    %c0_0 = arith.constant 0 : index
    %0 = vector.load %arg0[%c0, %c0_0] : memref<12x8xf32, #tpu.memory_space<vmem>>, vector<12x8xf32>
    %c0_1 = arith.constant 0 : index
    %c0_2 = arith.constant 0 : index
    %1 = vector.load %arg1[%c0_1, %c0_2] : memref<8x12xf32, #tpu.memory_space<vmem>>, vector<8x12xf32>
    %cst = arith.constant dense<0.000000e+00> : vector<8x8xf32>
    %2 = tpu.matmul %1, %0, %cst {dimension_numbers = #tpu.dot_dimension_numbers<[1], [0], [0], [1], [0, 0, 1, 1], [], []>} : vector<8x12xf32>, vector<12x8xf32>, vector<8x8xf32> -> vector<8x8xf32>
    %c0_3 = arith.constant 0 : index
    %c0_4 = arith.constant 0 : index
    %3 = vector.load %arg2[%c0_3, %c0_4] : memref<8x1xf32, #tpu.memory_space<vmem>>, vector<8x1xf32>
    %4 = vector.broadcast %3 : vector<8x1xf32> to vector<8x8xf32>
    %5 = arith.addf %2, %4 : vector<8x8xf32>
    %cst_5 = arith.constant 0.000000e+00 : f32
    %6 = vector.broadcast %cst_5 : f32 to vector<8x8xf32>
    %7 = arith.maximumf %5, %6 : vector<8x8xf32>
    %cst_6 = arith.constant 1.000000e+00 : f32
    %8 = vector.broadcast %cst_6 : f32 to vector<8x1xf32>
    %cst_7 = arith.constant dense<0.000000e+00> : vector<8x1xf32>
    %9 = tpu.matmul %7, %8, %cst_7 {dimension_numbers = #tpu.dot_dimension_numbers<[1], [0], [0], [1], [0, 0, 1, 1], [], []>} : vector<8x8xf32>, vector<8x1xf32>, vector<8x1xf32> -> vector<8x1xf32>
    %cst_8 = arith.constant 1.250000e-01 : f32
    %10 = vector.broadcast %cst_8 : f32 to vector<8x1xf32>
    %11 = arith.mulf %9, %10 : vector<8x1xf32>
    %12 = vector.broadcast %11 : vector<8x1xf32> to vector<8x8xf32>
    %13 = arith.subf %7, %12 : vector<8x8xf32>
    %14 = arith.mulf %13, %13 : vector<8x8xf32>
    %cst_9 = arith.constant dense<0.000000e+00> : vector<8x1xf32>
    %15 = tpu.matmul %14, %8, %cst_9 {dimension_numbers = #tpu.dot_dimension_numbers<[1], [0], [0], [1], [0, 0, 1, 1], [], []>} : vector<8x8xf32>, vector<8x1xf32>, vector<8x1xf32> -> vector<8x1xf32>
    %cst_10 = arith.constant 1.250000e-01 : f32
    %16 = vector.broadcast %cst_10 : f32 to vector<8x1xf32>
    %17 = arith.mulf %15, %16 : vector<8x1xf32>
    %c0_11 = arith.constant 0 : index
    %c0_12 = arith.constant 0 : index
    %18 = vector.load %arg3[%c0_11, %c0_12] : memref<8x1xf32, #tpu.memory_space<vmem>>, vector<8x1xf32>
    %cst_13 = arith.constant 9.99999974E-6 : f32
    %19 = vector.broadcast %cst_13 : f32 to vector<8x1xf32>
    %20 = arith.addf %17, %19 : vector<8x1xf32>
    %21 = math.rsqrt %20 : vector<8x1xf32>
    %22 = arith.mulf %18, %21 : vector<8x1xf32>
    %c0_14 = arith.constant 0 : index
    %c0_15 = arith.constant 0 : index
    %23 = vector.load %arg5[%c0_14, %c0_15] : memref<8x4xf32, #tpu.memory_space<vmem>>, vector<8x4xf32>
    %24 = vector.broadcast %22 : vector<8x1xf32> to vector<8x4xf32>
    %25 = arith.mulf %23, %24 : vector<8x4xf32>
    %c0_16 = arith.constant 0 : index
    %c0_17 = arith.constant 0 : index
    %26 = vector.load %arg5[%c0_16, %c0_17] : memref<8x4xf32, #tpu.memory_space<vmem>>, vector<8x4xf32>
    %c0_18 = arith.constant 0 : index
    %c0_19 = arith.constant 0 : index
    %27 = vector.load %arg4[%c0_18, %c0_19] : memref<8x1xf32, #tpu.memory_space<vmem>>, vector<8x1xf32>
    %cst_20 = arith.constant dense<0.000000e+00> : vector<4x1xf32>
    %28 = tpu.matmul %26, %27, %cst_20 {dimension_numbers = #tpu.dot_dimension_numbers<[0], [0], [1], [1], [0, 1, 1, 1], [], []>} : vector<8x4xf32>, vector<8x1xf32>, vector<4x1xf32> -> vector<4x1xf32>
    %c0_21 = arith.constant 0 : index
    %c0_22 = arith.constant 0 : index
    %29 = vector.load %arg6[%c0_21, %c0_22] : memref<4x1xf32, #tpu.memory_space<vmem>>, vector<4x1xf32>
    %30 = arith.addf %28, %29 : vector<4x1xf32>
    %cst_23 = arith.constant dense<0.000000e+00> : vector<4x8xf32>
    %31 = tpu.matmul %25, %13, %cst_23 {dimension_numbers = #tpu.dot_dimension_numbers<[0], [0], [1], [1], [0, 1, 1, 1], [], []>} : vector<8x4xf32>, vector<8x8xf32>, vector<4x8xf32> -> vector<4x8xf32>
    %32 = vector.broadcast %30 : vector<4x1xf32> to vector<4x8xf32>
    %33 = arith.addf %31, %32 : vector<4x8xf32>
    %cst_24 = arith.constant 0.000000e+00 : f32
    %34 = vector.broadcast %cst_24 : f32 to vector<4x8xf32>
    %35 = arith.maximumf %33, %34 : vector<4x8xf32>
    %c0_25 = arith.constant 0 : index
    %c0_26 = arith.constant 0 : index
    %36 = vector.load %arg7[%c0_25, %c0_26] : memref<4x8xf32, #tpu.memory_space<vmem>>, vector<4x8xf32>
    tpu.vector_store %arg7[%c0_25, %c0_26], %35 {strides = array<i32>} : memref<4x8xf32, #tpu.memory_space<vmem>>, vector<4x8xf32>,
    return
  }
}

</mosaic_0001>

<bundles_post_ra>
// kernel: tpu_custom_call.1
= control target key start
LH: loop header
LB: loop body
LE: loop exit
PB: predicated region body
PF: predicated region fallthrough
CT: control target
= control target key end

     0   :  { %vm40_vm0 = vcmask 1043456   ;;  %v599_v2 = vmov 0.0|0.0   ;;  %vm600_vm1 = vmmov 1   ;;  %vm601_vm3 = vmmov 0   ;;  %s691_s0 = inlined_call_operand.vmem [shape: f32[12,8], index: 0, kind: input, shape index: {}]   ;;  %s692_s1 = inlined_call_operand.vmem [shape: f32[8,12], index: 1, kind: input, shape index: {}]   ;;  %s693_s2 = inlined_call_operand.vmem [shape: f32[8,1], index: 2, kind: input, shape index: {}]   ;;  %s694_s3 = inlined_call_operand.vmem [shape: f32[8,1], index: 3, kind: input, shape index: {}]   ;;  %s695_s4 = inlined_call_operand.vmem [shape: f32[8,1], index: 4, kind: input, shape index: {}]   ;;  %s696_s5 = inlined_call_operand.vmem [shape: f32[8,4], index: 5, kind: input, shape index: {}]   ;;  %s697_s6 = inlined_call_operand.vmem [shape: f32[4,1], index: 6, kind: input, shape index: {}]   ;;  %s698_s7 = inlined_call_operand.hbm [shape: f32[4,8], index: 7, kind: output, shape index: {}]  }
   0x1   :  { %v27_v0 = vld [vmem:[%s691_s0] sm:$0xff]  ;;  %v28_v1 = vld [vmem:[%s691_s0 + $0x8] sm:$0xf]  ;;  %560 = vmatprep.subr.bf16.mxu0 %v599_v2  ;;  %vm562_vm2 = vmpackc.low %vm40_vm0, %vm600_vm1  ;;  %v602_v5 = vmov 0.0  }
   0x2   :  { %v561_v3 = vpack.c.bf16 %v28_v1, %v27_v0  ;;  %v30_v4 = vld [vmem:[%s693_s2] sm:$0xff]  ;;  %537 = vmatprep.mubr.msk.f32.mxu0 %vm601_vm3, %v602_v5  ;;  %540 = vmatprep.subr.mxu1 %v602_v5 }
   0x3   :  { %12 = vsyncpa [#allocation3], 0  ;;  %v29_v6 = vld [vmem:[%s692_s1] sm:$0xff]  ;;  %vm36_vm4 = vcmask 97280   ;;  %v603_v7 = vmov 0   ;;  %542 = vmatprep.mubr.msk.f32.mxu1 %vm601_vm3, %v602_v5  ;;  %v604_v8 = vmov 1.0  }
   0x4   :  { %563 = vmatpush3.bf16.msk.msra.mxu0 %vm562_vm2, %v561_v3  ;;  %571 = vset.pattern.permute.xlu0 %v603_v7  ;;  %vm115_vm5 = vcmask 64512   ;;  %v271_v24 = vld [vmem:[%s694_s3] sm:$0xff]  ;;  %vm500_vm6 = vcmask 60416  }
   0x5   :  { %33 = vperm.xlu0 %571, %v30_v4   ;;  %572 = vset.pattern.permute.xlu1 %v603_v7  ;;  %v282_v27 = vld [vmem:[%s695_s4] sm:$0xff]  ;;  %s605_s4 = smov [#allocation2]  }
   0x6   :  { %550 = vmatprep.subr.mxu0 %v602_v5  ;;  %541 = vmatpush3.msra.mxu1 %v604_v8  ;;  %v275_v28 = vld [vmem:[%s696_s5] sm:$0xff]  ;;  %s508_s5 = sshll.u32 %s605_s4, 4  ;;  %s509_s5 = int_to_ptr.vmem [resolvable:$true] %s508_s5 }
   0x7   :  { %538 = vmatmul.mubr.msk.f32.vlgmr.msra.gmra.mrb[0].mxu0 %vm36_vm4, %v29_v6  ;;  %545 = vmatprep.subr.mxu1 %v602_v5  ;;  %v283_v33 = vld [vmem:[%s697_s6] sm:$0xf]  ;;  %s575_s13 = scalar_lea.vmem %s509_s5, 64  ;;  %p580_p1 = scmp.lt.s32.totalorder %s509_s5, %s509_s5 }
   0x8   :  { %552 = vmatprep.mubr.msk.f32.mxu0 %vm601_vm3, %v602_v5  ;;  %551 = vmatpush3.msra.mxu0 %v282_v27  ;;  %p576_p0 = scmp.ne.s32.totalorder %s509_s5, %s575_s13  ;;  %p581_p2 = scmp.lt.s32.totalorder %s575_s13, %s575_s13 }
   0xa   :  { %p582_p3 = por %p581_p2, %p580_p1 }
   0xc   :  { %p583_p4 = pnand %p582_p3, %p576_p0 }
  0x84   :  { %v34_v9 = vpop.permute.xlu0 %33 }
  0xda   :  { %v110_v10 = vpop.f32.mrb[0].mxu0 }
  0xdb   :  { %v111_v11 = vadd.f32 %v110_v10, %v34_v9  ;;  %v539_v12 = vpop.f32.mrb[1].mxu0 }
  0xdd   :  { %v114_v13 = vmax.f32 %v111_v11, 0.0 }
  0xdf   :  { %543 = vmatmul.mubr.msk.f32.vlgmr.msra.gmra.mrb[0].mxu1 %vm115_vm5, %v114_v13 }
  0xe0   :  { %546 = vmatpush3.msra.mxu1 %v604_v8  ;;  %547 = vmatprep.mubr.msk.f32.mxu1 %vm601_vm3, %v602_v5 }
  0xe1   :  { %555 = vmatprep.subr.mxu1 %v602_v5 }
 0x1b2   :  { %v185_v14 = vpop.f32.mrb[0].mxu1 }
 0x1b3   :  { %v189_v15 = vmul.f32 0.125, %v185_v14  ;;  %v544_v16 = vpop.f32.mrb[1].mxu1 }
 0x1b5   :  { %192 = vperm.xlu0 %571, %v189_v15  }
 0x234   :  { %v193_v17 = vpop.permute.xlu0 %192 }
 0x235   :  { %v195_v18 = vsub.f32 %v114_v13, %v193_v17 }
 0x237   :  { %v196_v19 = vmul.f32 %v195_v18, %v195_v18 }
 0x239   :  { %548 = vmatmul.mubr.msk.f32.vlgmr.msra.gmra.mrb[2].mxu1 %vm115_vm5, %v196_v19 }
 0x23a   :  { %556 = vmatpush3.msra.mxu1 %v195_v18  ;;  %557 = vmatprep.mubr.msk.f32.mxu1 %vm601_vm3, %v602_v5 }
 0x30c   :  { %v266_v20 = vpop.f32.mrb[2].mxu1 }
 0x30d   :  { %v270_v21 = vmul.f32 0.125, %v266_v20  ;;  %v549_v22 = vpop.f32.mrb[3].mxu1 }
 0x30f   :  { %v272_v23 = vadd.f32 1e-05, %v270_v21 }
 0x311   :  { %573 = vrsqrt.f32 %v272_v23 }
 0x31b   :  { %v574_v25 = vpop.eup %573 }
 0x31c   :  { %v274_v26 = vmul.f32 %v574_v25, %v271_v24 }
 0x31e   :  { %278 = vperm.xlu1 %572, %v274_v26  }
 0x347   :  { %284 = vxpose.xlu1.b32.start.end [1/1] (short) (narrow) %v275_v28, 8 }
 0x39d   :  { %v279_v29 = vpop.permute.xlu1 %278 }
 0x39e   :  { %v281_v30 = vmul.f32 %v279_v29, %v275_v28 }
 0x3a0   :  { %394 = vxpose.xlu0.b32.start.end [1/1] (short) (narrow) %v281_v30, 8 }
 0x3c7   :  { %v300_v31 = vpop.trf.xlu1 }
 0x3c8   :  { %553 = vmatmul.mubr.msk.f32.vlgmr.msra.gmra.mrb[2].mxu0 %vm115_vm5, %v300_v31 }
 0x420   :  { %v410_v32 = vpop.trf.xlu0 }
 0x421   :  { %558 = vmatmul.mubr.msk.f32.vlgmr.msra.gmra.mrb[4].mxu1 %vm115_vm5, %v410_v32 }
 0x49b   :  { %v385_v34 = vpop.f32.mrb[2].mxu0 }
 0x49c   :  { %v386_v35 = vadd.f32 %v385_v34, %v283_v33  ;;  %v554_v36 = vpop.f32.mrb[3].mxu0 }
 0x49e   :  { %391 = vperm.xlu0 %571, %v386_v35  }
 0x4f4   :  { %v495_v37 = vpop.f32.mrb[4].mxu1 }
 0x4f5   :  { %v559_v38 = vpop.f32.mrb[5].mxu1 }
 0x51d   :  { %v392_v39 = vpop.permute.xlu0 %391 }
 0x51e   :  { %v496_v40 = vadd.f32 %v495_v37, %v392_v39 }
 0x520   :  { %v499_v41 = vmax.f32 %v496_v40, 0.0 }
 0x522   :  { %501 = vst.msk [vmem:[#allocation2] sm:$0xf] %vm500_vm6, %v499_v41 }
 0x523   :  { %586 = shalt.err (!%p583_p4)
}
 0x524   :  { %s587_s15 = scalar_lea.hbm %s698_s7, 64 }
 0x525   :  { %p588_p5 = scmp.ne.s32.totalorder %s698_s7, %s587_s15  ;;  %p591_p6 = scmp.lt.u32.totalorder %s587_s15, %s698_s7 }
 0x527   :  { %p593_p7 = pnand %p591_p6, %p588_p5 }
 0x529   :  { %596 = shalt.err (!%p593_p7)
}
 0x52a   :  { %511 = dma.vmem_to_hbm [thread:$0]  %s509_s5, 64, %s698_s7, [#allocation3]  }
 0x52b   :  { %597 = dma.done.wait [#allocation3], 64  }
 0x52c   :  { %598 = vsyncadd [#allocation3], 4294967232 }
 0x52d   :  { %515 = vsyncpa [#allocation3], 1 }

</bundles_post_ra>
